<compile_context>
chip_gen: v5e
topology: v5e:2x2
jax: 0.10.0
libtpu: 0.0.40
codegen_flags: <defaults>
</compile_context>

<pallas_src>
import functools
import math

import jax
import jax.numpy as jnp
from jax.experimental import pallas as pl
from jax.experimental.pallas import tpu as pltpu


def _token_conv_kernel(x_ref, w_ref, o_ref):
    """Single-matmul im2col conv tile.

    x_ref: (Rt, 3C) im2col rows (tap-major, channel-minor) in VMEM.
    w_ref: (3C, D)  folded conv weights in VMEM.
    o_ref: (Rt, D)  output rows; last dim is the full (lane-dense) d_model.
    """
    o_ref[...] = jnp.dot(
        x_ref[...], w_ref[...], preferred_element_type=jnp.float32
    ).astype(o_ref.dtype)


def _pick_row_tile(M, K, D, compute_dtype, out_dtype):
    """Rows per grid step: big enough to amortize step overhead, small enough
    for v7x's default-scoped VMEM, and >=2 steps when possible (2 TCs)."""
    in_b = jnp.dtype(compute_dtype).itemsize
    out_b = jnp.dtype(out_dtype).itemsize
    per_row = 2 * (K * in_b + D * out_b)            # double-buffered in + out bytes / row
    vmem_rows = max(8, (24 * 1024 * 1024) // max(per_row, 1))
    rt = min(M, 1024, vmem_rows)                    # >=512 rows already ~85% of HBM roofline
    if M >= 16:
        rt = min(rt, M // 2)                        # keep >=2 grid steps for v7x megacore
    if rt >= M:
        return M                                    # single full block (always a legal block shape)
    return max(8, (rt // 8) * 8)                    # sublane-aligned tiles


def token_embedding(x, weight, *, compute_dtype=jnp.bfloat16, out_dtype=None,
                    row_tile=None):
    """x: (B, L, C); weight: (D, C, 3) in PyTorch Conv1d layout -> (B, L, D)."""
    B, L, C = x.shape
    D = weight.shape[0]
    out_dtype = jnp.dtype(x.dtype if out_dtype is None else out_dtype)

    # im2col with the circular wrap folded in (one XLA prep op, no (L+2) pad copy):
    #   xp3[b, l, k*C + c] = x[b, (l + k - 1) mod L, c]
    xp3 = jnp.concatenate(
        [jnp.roll(x, 1, axis=1), x, jnp.roll(x, -1, axis=1)], axis=-1)
    lhs = xp3.reshape(B * L, 3 * C).astype(compute_dtype)

    # Weight relayout (D, C, 3) -> (3C, D): row k*C + c holds W[:, c, k].
    w3 = jnp.transpose(weight, (2, 1, 0)).reshape(3 * C, D).astype(compute_dtype)

    M, K = B * L, 3 * C
    rt = _pick_row_tile(M, K, D, compute_dtype, out_dtype) if row_tile is None else row_tile

    out = pl.pallas_call(
        _token_conv_kernel,
        out_shape=jax.ShapeDtypeStruct((M, D), out_dtype),
        grid=(pl.cdiv(M, rt),),
        in_specs=[pl.BlockSpec((rt, K), lambda i: (i, 0)),
                  pl.BlockSpec((K, D), lambda i: (0, 0))],
        out_specs=pl.BlockSpec((rt, D), lambda i: (i, 0)),
        compiler_params=pltpu.CompilerParams(
            dimension_semantics=("parallel",)),
    )(lhs, w3)
    return out.reshape(B, L, D)


def token_embedding_reference(x, weight):
    """Pure-JAX reference of the circular-padded Conv1d token embedding."""
    B, L, C = x.shape
    xp = jnp.concatenate([x[:, -1:, :], x, x[:, :1, :]], axis=1)
    out = jnp.zeros((B, L, weight.shape[0]), jnp.float32)
    for k in range(3):
        out = out + jnp.einsum("blc,dc->bld", xp[:, k:k + L, :], weight[:, :, k])
    return out


if __name__ == "__main__":
    B, L, C, D = 2, 16, 8, 128   # batch, seq_len, c_in, d_model (lane-dense)

    key = jax.random.PRNGKey(0)
    kx, kw = jax.random.split(key)
    x = jax.random.normal(kx, (B, L, C), jnp.float32)
    # kaiming_normal_(mode='fan_in', nonlinearity='leaky_relu') on (D, C, 3)
    fan_in = C * 3
    gain = math.sqrt(2.0 / (1.0 + 0.01 ** 2))
    weight = (gain / math.sqrt(fan_in)) * jax.random.normal(
        kw, (D, C, 3), jnp.float32)

    ref = token_embedding_reference(x, weight)

    # f32-operand path: must match the fp32 PyTorch semantics tightly.
    out_f32 = jax.block_until_ready(
        jax.jit(functools.partial(token_embedding, compute_dtype=jnp.float32))(
            x, weight))
    assert out_f32.shape == (B, L, D), out_f32.shape
    assert bool(jnp.all(jnp.isfinite(out_f32)))
    assert bool(jnp.allclose(out_f32, ref, rtol=1e-4, atol=1e-4)), (
        float(jnp.max(jnp.abs(out_f32 - ref))))

    # Default perf path (bf16 operands, f32 accumulation): looser tolerance.
    out = jax.block_until_ready(jax.jit(token_embedding)(x, weight))
    assert out.shape == (B, L, D), out.shape
    assert bool(jnp.all(jnp.isfinite(out)))
    assert bool(jnp.allclose(out, ref, rtol=3e-2, atol=3e-2)), (
        float(jnp.max(jnp.abs(out - ref))))

    print("KERNEL_OK")
</pallas_src>

<mosaic_0001>
module attributes {stable_mosaic.version = 11 : i64} {
  func.func @_token_conv_kernel(%arg0: i32, %arg1: memref<16x24xf32, #tpu.memory_space<vmem>>, %arg2: memref<24x128xf32, #tpu.memory_space<vmem>>, %arg3: memref<16x128xf32, #tpu.memory_space<vmem>>) attributes {dimension_semantics = [#tpu.dimension_semantics<parallel>], iteration_bounds = array<i64: 2>, scalar_prefetch = 0 : i64, scratch_operands = 0 : i64, tpu.core_type = #tpu.core_type<tc>, window_params = [{transform_indices = @transform_0, window_bounds = array<i64: 16, 24>}, {pipeline_mode = #tpu.pipeline_mode<synchronous>, transform_indices = @transform_1, window_bounds = array<i64: 24, 128>}, {transform_indices = @transform_2, window_bounds = array<i64: 16, 128>}]} {
    %c0 = arith.constant 0 : index
    %c0_0 = arith.constant 0 : index
    %0 = vector.load %arg1[%c0, %c0_0] : memref<16x24xf32, #tpu.memory_space<vmem>>, vector<16x24xf32>
    %c0_1 = arith.constant 0 : index
    %c0_2 = arith.constant 0 : index
    %1 = vector.load %arg2[%c0_1, %c0_2] : memref<24x128xf32, #tpu.memory_space<vmem>>, vector<24x128xf32>
    %cst = arith.constant dense<0.000000e+00> : vector<16x128xf32>
    %2 = tpu.matmul %0, %1, %cst {dimension_numbers = #tpu.dot_dimension_numbers<[1], [0], [0], [1], [0, 0, 1, 1], [], []>} : vector<16x24xf32>, vector<24x128xf32>, vector<16x128xf32> -> vector<16x128xf32>
    %c0_3 = arith.constant 0 : index
    %c0_4 = arith.constant 0 : index
    %3 = vector.load %arg3[%c0_3, %c0_4] : memref<16x128xf32, #tpu.memory_space<vmem>>, vector<16x128xf32>
    tpu.vector_store %arg3[%c0_3, %c0_4], %2 {strides = array<i32>} : memref<16x128xf32, #tpu.memory_space<vmem>>, vector<16x128xf32>,
    return
  }
  func.func @transform_0(%arg0: i32) -> (i32, i32) {
    %c0_i32 = arith.constant 0 : i32
    %c0_i32_0 = arith.constant 0 : i32
    return %arg0, %c0_i32 : i32, i32
  }
  func.func @transform_1(%arg0: i32) -> (i32, i32) {
    %c0_i32 = arith.constant 0 : i32
    %c0_i32_0 = arith.constant 0 : i32
    %c0_i32_1 = arith.constant 0 : i32
    return %c0_i32, %c0_i32_0 : i32, i32
  }
  func.func @transform_2(%arg0: i32) -> (i32, i32) {
    %c0_i32 = arith.constant 0 : i32
    %c0_i32_0 = arith.constant 0 : i32
    return %arg0, %c0_i32 : i32, i32
  }
}

</mosaic_0001>

<bundles_post_ra>
// kernel: token_embedding.1
= control target key start
LH: loop header
LB: loop body
LE: loop exit
PB: predicated region body
PF: predicated region fallthrough
CT: control target
= control target key end

     0   :  { %7 = vsyncpa [#allocation3], 0  ;;  %s493_s0 = inlined_call_operand.vmem [shape: f32[32,24], index: 0, kind: input, shape index: {}]   ;;  %s494_s1 = inlined_call_operand.vmem [shape: f32[24,128], index: 1, kind: input, shape index: {}]   ;;  %s495_s2 = inlined_call_operand.hbm [shape: f32[32,128], index: 2, kind: output, shape index: {}]  }
   0x1   :  { %9 = vsyncpa [#allocation3 + $0x1], 0  ;;  %s400_s9 = smov 0   ;;  %s402_s10 = smov 0  }
   0x2   :  { %s404_s11 = smov 0   ;;  %s406_s12 = smov 0  }
   0x3 LB: > { %s421_s13 = sadd.s32 4294967295, %s381_s12   ;;  %s260_s14 = sadd.s32 4294967294, %s381_s12   ;;  %s381_s12 = sphi %s406_s12, %s501_s12   ;;  %s377_s11 = sphi %s404_s11, %s500_s11   ;;  %s373_s10 = sphi %s402_s10, %s499_s10   ;;  %s369_s9 = sphi %s400_s9, %s498_s9  }
   0x4   : > { %s425_s15 = sadd.s32 1, %s381_s12   ;;  %s69_s16 = sadd.s32 1, %s377_s11 }
   0x5   : > { %s66_s17 = ssub.s32 %s381_s12, %s425_s15  ;;  %p79_p0 = scmp.ne.s32.totalorder %s377_s11, %s373_s10 }
   0x6   : > { %p67_p1 = scmp.eq.s32.totalorder %s66_s17, 0  ;;  %p80_p2 = scmp.eq.s32.totalorder %s421_s13, 1 }
   0x7   : > { %p85_p3 = scmp.ne.s32.totalorder %s373_s10, %s369_s9  ;;  %p86_p4 = scmp.eq.s32.totalorder %s260_s14, 1 }
   0x8   : > { %s436_s18 = scalar_select %p67_p1, %s377_s11, %s69_s16  }
   0x9   : > { %p438_p5 = por %p80_p2, %p79_p0  ;;  %p442_p6 = por %p86_p4, %p85_p3 }
   0xa   : > { %p263_p7 = scmp.ge.s32.totalorder %s381_s12, 1  ;;  %p116_p8 = scmp.lt.s32.totalorder %s381_s12, 3 }
   0xc   : > { %p117_p9 = pnand %p263_p7, %p116_p8 }
   0xd   : > { %s265_s25 = sshll.u32 (!%p117_p9), %s421_s13, 1  ;;  %s135_s4 = sand.u32 (!%p117_p9), 1, %s373_s10  }
   0xe   : > { %120 = sbr.rel (%p117_p9) target bundleno = 156 (0x9c), region = 28  ;;  %p139_p10 = scmp.lt.s32.totalorder (!%p117_p9), %s265_s25, 3 }
   0xf   : > { %s264_s5 = sshll.u32 (!%p117_p9), %s135_s4, 4  ;;  %s274_s6 = sshll.u32 (!%p117_p9), %s421_s13, 4 }
  0x10   : > { %s194_s14 = scalar_lea.hbm (!%p117_p9), %s495_s2, %s274_s6  ;;  %s137_s16 = scalar_lea.vmem (!%p117_p9), [#allocation2], %s264_s5 }
  0x11   : > { %s195_s17 = sshll.u32 (!%p117_p9), %s137_s16, 4  ;;  %s197_s21 = sshll.u32 (!%p117_p9), %s194_s14, 4  ;;  %s196_s17 = int_to_ptr.vmem [resolvable:$true] %s195_s17  ;;  %s198_s21 = int_to_ptr.hbm [resolvable:$true] %s197_s21 }
  0x12   : > { %s183_s22 = scalar_lea.sflag (!%p117_p9), [#allocation3], %s135_s4  ;;  %s333_s23 = sshra.s32 (!%p117_p9), %s198_s21, 4  ;;  %s334_s23 = int_to_ptr.hbm [resolvable:$true] %s333_s23 }
  0x13   : > { %v149_v0 = vld [vmem:[%s494_s1 + $0x10] sm:$0xff]  ;;  %v148_v1 = vld [vmem:[%s494_s1 + $0x8] sm:$0xff]  ;;  %v147_v2 = vld [vmem:[%s494_s1] sm:$0xff]  ;;  %s503_s25 = smov (!%p139_p10, %s265_s25), 3  ;;  %vm150_vm0 = vcmask 195584   ;;  %s335_s24 = scalar_lea.hbm %s334_s23, 16 }
  0x14   : > { %170 = vmatpush.msra.mxu0 %v149_v0  ;;  %275 = vmatpush.msra.mxu1 %v149_v0  ;;  %s266_s28 = sshll.u32 %s503_s25, 3  ;;  %p336_p11 = scmp.ne.s32.totalorder %s334_s23, %s335_s24 }
  0x15   : > { %s142_s3 = scalar_lea.vmem %s493_s0, %s266_s28  ;;  %s339_s26 = scalar_lea.hbm %s495_s2, 32 }
  0x16   : > { %171 = vmatpush.msra.mxu0 %v148_v1  ;;  %276 = vmatpush.msra.mxu1 %v148_v1  ;;  %v145_v3 = vld [vmem:[%s142_s3] sm:$0xff]  ;;  %v146_v4 = vld [vmem:[%s142_s3 + $0x8] sm:$0xff]  ;;  %p337_p12 = pnand %p336_p11, %p438_p5  ;;  %p340_p0 = scmp.lt.s32.totalorder %s334_s23, %s495_s2 }
  0x17   : > { %p341_p1 = scmp.lt.s32.totalorder %s339_s26, %s335_s24 }
  0x18   : > { %172 = vmatpush.msra.mxu0 %v147_v2  ;;  %277 = vmatpush.msra.mxu1 %v147_v2  ;;  %p338_p13 = pneg %p337_p12 }
  0x19   : > { %267 = vmatmul.msk.f32.vlgmr.msra.gmra.mxu0 %vm150_vm0, %v145_v3  ;;  %268 = vmatmul.msk.f32.vlgmr.msra.gmra.mxu1 %vm150_vm0, %v146_v4  ;;  %p342_p2 = por %p341_p1, %p340_p0 }
  0x1b   : > { %p343_p3 = pnand %p342_p2, %p338_p13 }
  0x96   : > { %v174_v5 = vpop.f32.mrf.mxu0  ;;  %v177_v6 = vpop.f32.mrf.mxu1 }
  0x97   : > { %180 = vst [vmem:[%s137_s16] sm:$0xff] %v174_v5 }
  0x98   : > { %181 = vst [vmem:[%s137_s16 + $0x8] sm:$0xff] %v177_v6 }
  0x99   : > { %346 = shalt.err (!%p343_p3)
}
  0x9a   : > { %s383_s29 = smov 128   ;;  %s384_s30 = smov 8  }
  0x9b   : > { %278 = dma.vmem_to_hbm [thread:$0]  (%p438_p5), %s196_s17, 256, %s198_s21, %s183_s22, %s383_s29, %s383_s29, %s384_s30  }
  0x9c PF: > { %p284_p4 = scmp.ge.s32.totalorder %s381_s12, 2  ;;  %s212_s3 = sand.u32 1, %s369_s9  }
  0x9d   : > { %s213_s4 = scalar_lea.sflag [#allocation3], %s212_s3 }
  0x9e   : > { %p281_p7 = pnand %p284_p4, %p442_p6 }
  0xa0   : > { %p282_p8 = pneg %p281_p7 }
  0xa2   : > { %364 = dma.done.wait (%p282_p8), %s213_s4, 256  }
  0xa3   : > { %366 = vsyncadd (%p282_p8), %s213_s4, 4294967040  ;;  %p12_p9 = scmp.ge.s32.totalorder %s425_s15, 4   ;;  %s498_s9 = smov %s373_s10 }
  0xa4   : > { %s499_s10 = smov %s377_s11  ;;  %s500_s11 = smov %s436_s18 }
  0xa5   : > { %s501_s12 = smov %s425_s15  ;;  %14 = sbr.rel (!%p12_p9) target bundleno = 3 (0x3), region = 63 }
  0xaa   :  { %219 = vsyncpa [#allocation3], 1 }
  0xab   :  { %221 = vsyncpa [#allocation3 + $0x1], 1 }

</bundles_post_ra>
